<compile_context>
chip_gen: v6e
topology: v6e:2x2x1
jax: 0.10.0
libtpu: 0.0.40
codegen_flags: <defaults>
</compile_context>

<pallas_src>
import functools

import jax
import jax.numpy as jnp
from jax.experimental import pallas as pl
from jax.experimental.pallas import tpu as pltpu

_LANE = 128      # vreg lane width  (last dim)
_SUBLANE = 8     # f32 sublane width (second-to-last dim)


def _round_up(x, m):
    return (x + m - 1) // m * m


def _pad2d(a, rows, cols):
    pr, pc = rows - a.shape[0], cols - a.shape[1]
    if pr == 0 and pc == 0:
        return a
    return jnp.pad(a, ((0, pr), (0, pc)))


def _mlp_kernel(num_linear, negative_slope, *refs):
    """Fused MLP over one batch tile.

    refs = (x_ref, w_0..w_{L-1}, b_0..b_{L-1}, o_ref); weights are [in, out].
    """
    x_ref = refs[0]
    w_refs = refs[1:1 + num_linear]
    b_refs = refs[1 + num_linear:1 + 2 * num_linear]
    o_ref = refs[1 + 2 * num_linear]

    h = x_ref[...]
    for i in range(num_linear):
        w = w_refs[i][...]
        # Cast activations at the dot boundary only (weights are pre-cast on host).
        lhs = h if h.dtype == w.dtype else h.astype(w.dtype)
        h = jnp.dot(lhs, w, preferred_element_type=jnp.float32)   # MXU, f32 accumulate
        h = h + b_refs[i][...]                                    # f32 elementwise
        if i < num_linear - 1:                                    # LeakyReLU (not on last)
            h = jnp.where(h >= 0, h, negative_slope * h)
    o_ref[...] = h.astype(o_ref.dtype)


def mlp_forward(x, weights, biases, *, leaky_relu_slope=0.2, batch_tile=256,
                use_bf16_matmul=False, vmem_limit_bytes=64 * 1024 * 1024):
    """MLP forward as a single fused Pallas kernel, tiled over batch.

    x:       [B, input_dim]
    weights: list of [in_i, out_i]   (transposed relative to PyTorch's [out, in])
    biases:  list of [out_i]
    """
    num_linear = len(weights)
    B, d_in = x.shape
    out_dim = weights[-1].shape[1]

    # ---- lane-dense padding: every feature dim -> multiple of 128 ----
    dims = [d_in] + [w.shape[1] for w in weights]
    dims_p = [_round_up(d, _LANE) for d in dims]

    w_dtype = jnp.bfloat16 if use_bf16_matmul else jnp.float32

    # ---- batch tiling: large sublane-aligned tiles, grid >= 2 for megacore ----
    B8 = _round_up(B, _SUBLANE)
    tb = min(_round_up(batch_tile, _SUBLANE), B8)
    if B8 // tb < 2 and B8 >= 2 * _SUBLANE:
        tb = _round_up(B8 // 2, _SUBLANE)
    B_pad = _round_up(B8, tb)
    grid = (B_pad // tb,)

    x_p = _pad2d(x, B_pad, dims_p[0])
    w_ps = [_pad2d(w, dims_p[i], dims_p[i + 1]).astype(w_dtype)
            for i, w in enumerate(weights)]
    b_ps = [_pad2d(b.reshape(1, -1).astype(jnp.float32), 1, dims_p[i + 1])
            for i, b in enumerate(biases)]

    kernel = functools.partial(_mlp_kernel, num_linear, leaky_relu_slope)

    # Batch tiled across the grid; weights/biases are resident (constant block).
    x_spec = pl.BlockSpec((tb, dims_p[0]), lambda i: (i, 0))
    w_specs = [pl.BlockSpec(w.shape, lambda i: (0, 0)) for w in w_ps]
    b_specs = [pl.BlockSpec(b.shape, lambda i: (0, 0)) for b in b_ps]
    out_spec = pl.BlockSpec((tb, dims_p[-1]), lambda i: (i, 0))

    flops = 2 * B_pad * sum(dims_p[i] * dims_p[i + 1] for i in range(num_linear))
    bytes_accessed = int(
        x_p.size * x_p.dtype.itemsize
        + sum(w.size * w.dtype.itemsize for w in w_ps)
        + sum(b.size * b.dtype.itemsize for b in b_ps)
        + B_pad * dims_p[-1] * x_p.dtype.itemsize)
    cost = pl.CostEstimate(flops=flops, transcendentals=0,
                           bytes_accessed=bytes_accessed)

    out_p = pl.pallas_call(
        kernel,
        out_shape=jax.ShapeDtypeStruct((B_pad, dims_p[-1]), x.dtype),
        grid_spec=pl.GridSpec(
            grid=grid,
            in_specs=[x_spec] + w_specs + b_specs,
            out_specs=out_spec,
        ),
        compiler_params=pltpu.CompilerParams(
            dimension_semantics=("parallel",),
            vmem_limit_bytes=vmem_limit_bytes),
        cost_estimate=cost,
    )(x_p, *w_ps, *b_ps)

    # Slice the batch / lane padding off.
    return out_p[:B, :out_dim]


def init_mlp_params(key, input_dim, hidden_dim, output_dim, num_layers):
    """Deterministic init mimicking nn.Linear default (uniform +/- 1/sqrt(fan_in))."""
    dims = [input_dim] + [hidden_dim] * num_layers + [output_dim]
    weights, biases = [], []
    for i in range(len(dims) - 1):
        fan_in, fan_out = dims[i], dims[i + 1]
        key, kw, kb = jax.random.split(key, 3)
        bound = 1.0 / jnp.sqrt(fan_in)
        # stored as [in, out] (transposed relative to PyTorch's [out, in])
        weights.append(jax.random.uniform(kw, (fan_in, fan_out), jnp.float32,
                                          -bound, bound))
        biases.append(jax.random.uniform(kb, (fan_out,), jnp.float32,
                                         -bound, bound))
    return weights, biases


def mlp_reference(x, weights, biases, leaky_relu_slope=0.2):
    h = x
    for i, (w, b) in enumerate(zip(weights, biases)):
        h = h @ w + b
        if i < len(weights) - 1:
            h = jnp.where(h >= 0, h, leaky_relu_slope * h)
    return h


if __name__ == "__main__":
    input_dim, hidden_dim, output_dim, num_layers = 16, 32, 8, 2
    batch = 16

    key = jax.random.PRNGKey(0)
    key, kx = jax.random.split(key)
    x = jax.random.normal(kx, (batch, input_dim), jnp.float32)
    weights, biases = init_mlp_params(key, input_dim, hidden_dim,
                                      output_dim, num_layers)

    out = mlp_forward(x, weights, biases, leaky_relu_slope=0.2)
    out = jax.block_until_ready(out)

    ref = mlp_reference(x, weights, biases, leaky_relu_slope=0.2)
    assert out.shape == (batch, output_dim)
    assert jnp.allclose(out, ref, atol=1e-5, rtol=1e-5), "mismatch vs reference"

    print("KERNEL_OK")
</pallas_src>

<mosaic_0001>
module attributes {stable_mosaic.version = 11 : i64} {
  func.func @_mlp_kernel(%arg0: i32, %arg1: memref<8x128xf32, #tpu.memory_space<vmem>>, %arg2: memref<128x128xf32, #tpu.memory_space<vmem>>, %arg3: memref<128x128xf32, #tpu.memory_space<vmem>>, %arg4: memref<128x128xf32, #tpu.memory_space<vmem>>, %arg5: memref<1x128xf32, #tpu.memory_space<vmem>>, %arg6: memref<1x128xf32, #tpu.memory_space<vmem>>, %arg7: memref<1x128xf32, #tpu.memory_space<vmem>>, %arg8: memref<8x128xf32, #tpu.memory_space<vmem>>) attributes {dimension_semantics = [#tpu.dimension_semantics<parallel>], iteration_bounds = array<i64: 2>, scalar_prefetch = 0 : i64, scratch_operands = 0 : i64, tpu.core_type = #tpu.core_type<tc>, window_params = [{transform_indices = @transform_0, window_bounds = array<i64: 8, 128>}, {pipeline_mode = #tpu.pipeline_mode<synchronous>, transform_indices = @transform_1, window_bounds = array<i64: 128, 128>}, {pipeline_mode = #tpu.pipeline_mode<synchronous>, transform_indices = @transform_2, window_bounds = array<i64: 128, 128>}, {pipeline_mode = #tpu.pipeline_mode<synchronous>, transform_indices = @transform_3, window_bounds = array<i64: 128, 128>}, {pipeline_mode = #tpu.pipeline_mode<synchronous>, transform_indices = @transform_4, window_bounds = array<i64: 1, 128>}, {pipeline_mode = #tpu.pipeline_mode<synchronous>, transform_indices = @transform_5, window_bounds = array<i64: 1, 128>}, {pipeline_mode = #tpu.pipeline_mode<synchronous>, transform_indices = @transform_6, window_bounds = array<i64: 1, 128>}, {transform_indices = @transform_7, window_bounds = array<i64: 8, 128>}]} {
    %c0 = arith.constant 0 : index
    %c0_0 = arith.constant 0 : index
    %0 = vector.load %arg1[%c0, %c0_0] : memref<8x128xf32, #tpu.memory_space<vmem>>, vector<8x128xf32>
    %c0_1 = arith.constant 0 : index
    %c0_2 = arith.constant 0 : index
    %1 = vector.load %arg2[%c0_1, %c0_2] : memref<128x128xf32, #tpu.memory_space<vmem>>, vector<128x128xf32>
    %cst = arith.constant dense<0.000000e+00> : vector<8x128xf32>
    %2 = tpu.matmul %0, %1, %cst {dimension_numbers = #tpu.dot_dimension_numbers<[1], [0], [0], [1], [0, 0, 1, 1], [], []>} : vector<8x128xf32>, vector<128x128xf32>, vector<8x128xf32> -> vector<8x128xf32>
    %c0_3 = arith.constant 0 : index
    %c0_4 = arith.constant 0 : index
    %3 = vector.load %arg5[%c0_3, %c0_4] : memref<1x128xf32, #tpu.memory_space<vmem>>, vector<1x128xf32>
    %4 = vector.broadcast %3 : vector<1x128xf32> to vector<8x128xf32>
    %5 = arith.addf %2, %4 : vector<8x128xf32>
    %cst_5 = arith.constant 0.000000e+00 : f32
    %6 = vector.broadcast %cst_5 : f32 to vector<8x128xf32>
    %7 = arith.cmpf oge, %5, %6 : vector<8x128xf32>
    %cst_6 = arith.constant 2.000000e-01 : f32
    %8 = vector.broadcast %cst_6 : f32 to vector<8x128xf32>
    %9 = arith.mulf %8, %5 : vector<8x128xf32>
    %10 = arith.select %7, %5, %9 : vector<8x128xi1>, vector<8x128xf32>
    %c0_7 = arith.constant 0 : index
    %c0_8 = arith.constant 0 : index
    %11 = vector.load %arg3[%c0_7, %c0_8] : memref<128x128xf32, #tpu.memory_space<vmem>>, vector<128x128xf32>
    %cst_9 = arith.constant dense<0.000000e+00> : vector<8x128xf32>
    %12 = tpu.matmul %10, %11, %cst_9 {dimension_numbers = #tpu.dot_dimension_numbers<[1], [0], [0], [1], [0, 0, 1, 1], [], []>} : vector<8x128xf32>, vector<128x128xf32>, vector<8x128xf32> -> vector<8x128xf32>
    %c0_10 = arith.constant 0 : index
    %c0_11 = arith.constant 0 : index
    %13 = vector.load %arg6[%c0_10, %c0_11] : memref<1x128xf32, #tpu.memory_space<vmem>>, vector<1x128xf32>
    %14 = vector.broadcast %13 : vector<1x128xf32> to vector<8x128xf32>
    %15 = arith.addf %12, %14 : vector<8x128xf32>
    %cst_12 = arith.constant 0.000000e+00 : f32
    %16 = vector.broadcast %cst_12 : f32 to vector<8x128xf32>
    %17 = arith.cmpf oge, %15, %16 : vector<8x128xf32>
    %cst_13 = arith.constant 2.000000e-01 : f32
    %18 = vector.broadcast %cst_13 : f32 to vector<8x128xf32>
    %19 = arith.mulf %18, %15 : vector<8x128xf32>
    %20 = arith.select %17, %15, %19 : vector<8x128xi1>, vector<8x128xf32>
    %c0_14 = arith.constant 0 : index
    %c0_15 = arith.constant 0 : index
    %21 = vector.load %arg4[%c0_14, %c0_15] : memref<128x128xf32, #tpu.memory_space<vmem>>, vector<128x128xf32>
    %cst_16 = arith.constant dense<0.000000e+00> : vector<8x128xf32>
    %22 = tpu.matmul %20, %21, %cst_16 {dimension_numbers = #tpu.dot_dimension_numbers<[1], [0], [0], [1], [0, 0, 1, 1], [], []>} : vector<8x128xf32>, vector<128x128xf32>, vector<8x128xf32> -> vector<8x128xf32>
    %c0_17 = arith.constant 0 : index
    %c0_18 = arith.constant 0 : index
    %23 = vector.load %arg7[%c0_17, %c0_18] : memref<1x128xf32, #tpu.memory_space<vmem>>, vector<1x128xf32>
    %24 = vector.broadcast %23 : vector<1x128xf32> to vector<8x128xf32>
    %25 = arith.addf %22, %24 : vector<8x128xf32>
    %c0_19 = arith.constant 0 : index
    %c0_20 = arith.constant 0 : index
    %26 = vector.load %arg8[%c0_19, %c0_20] : memref<8x128xf32, #tpu.memory_space<vmem>>, vector<8x128xf32>
    tpu.vector_store %arg8[%c0_19, %c0_20], %25 {strides = array<i32>} : memref<8x128xf32, #tpu.memory_space<vmem>>, vector<8x128xf32>,
    return
  }
  func.func @transform_0(%arg0: i32) -> (i32, i32) {
    %c0_i32 = arith.constant 0 : i32
    %c0_i32_0 = arith.constant 0 : i32
    return %arg0, %c0_i32 : i32, i32
  }
  func.func @transform_1(%arg0: i32) -> (i32, i32) {
    %c0_i32 = arith.constant 0 : i32
    %c0_i32_0 = arith.constant 0 : i32
    %c0_i32_1 = arith.constant 0 : i32
    return %c0_i32, %c0_i32_0 : i32, i32
  }
  func.func @transform_2(%arg0: i32) -> (i32, i32) {
    %c0_i32 = arith.constant 0 : i32
    %c0_i32_0 = arith.constant 0 : i32
    %c0_i32_1 = arith.constant 0 : i32
    return %c0_i32, %c0_i32_0 : i32, i32
  }
  func.func @transform_3(%arg0: i32) -> (i32, i32) {
    %c0_i32 = arith.constant 0 : i32
    %c0_i32_0 = arith.constant 0 : i32
    %c0_i32_1 = arith.constant 0 : i32
    return %c0_i32, %c0_i32_0 : i32, i32
  }
  func.func @transform_4(%arg0: i32) -> (i32, i32) {
    %c0_i32 = arith.constant 0 : i32
    %c0_i32_0 = arith.constant 0 : i32
    %c0_i32_1 = arith.constant 0 : i32
    return %c0_i32, %c0_i32_0 : i32, i32
  }
  func.func @transform_5(%arg0: i32) -> (i32, i32) {
    %c0_i32 = arith.constant 0 : i32
    %c0_i32_0 = arith.constant 0 : i32
    %c0_i32_1 = arith.constant 0 : i32
    return %c0_i32, %c0_i32_0 : i32, i32
  }
  func.func @transform_6(%arg0: i32) -> (i32, i32) {
    %c0_i32 = arith.constant 0 : i32
    %c0_i32_0 = arith.constant 0 : i32
    %c0_i32_1 = arith.constant 0 : i32
    return %c0_i32, %c0_i32_0 : i32, i32
  }
  func.func @transform_7(%arg0: i32) -> (i32, i32) {
    %c0_i32 = arith.constant 0 : i32
    %c0_i32_0 = arith.constant 0 : i32
    return %arg0, %c0_i32 : i32, i32
  }
}

</mosaic_0001>

<bundles_post_ra>
// kernel: tpu_custom_call.1
= control target key start
LH: loop header
LB: loop body
LE: loop exit
PB: predicated region body
PF: predicated region fallthrough
CT: control target
= control target key end

     0   :  { %s1478_s0 = inlined_call_operand.hbm [shape: f32[16,128], index: 0, kind: input, shape index: {}]   ;;  %s1479_s1 = inlined_call_operand.hbm [shape: f32[128,128], index: 1, kind: input, shape index: {}]   ;;  %s1480_s2 = inlined_call_operand.hbm [shape: f32[128,128], index: 2, kind: input, shape index: {}]   ;;  %s1481_s3 = inlined_call_operand.hbm [shape: f32[128,128], index: 3, kind: input, shape index: {}]   ;;  %s1482_s4 = inlined_call_operand.vmem [shape: f32[1,128], index: 4, kind: input, shape index: {}]   ;;  %s1483_s5 = inlined_call_operand.vmem [shape: f32[1,128], index: 5, kind: input, shape index: {}]   ;;  %s1484_s6 = inlined_call_operand.vmem [shape: f32[1,128], index: 6, kind: input, shape index: {}]   ;;  %s1485_s7 = inlined_call_operand.hbm [shape: f32[16,128], index: 7, kind: output, shape index: {}]  }
   0x1   :  { %1490 = sst [smem:[#allocation15_spill]] %s1479_s1 }
   0x2   :  { %1491 = sst [smem:[#allocation16_spill]] %s1480_s2 }
   0x3   :  { %12 = vsyncpa [#allocation3], 0 }
   0x4   :  { %14 = vsyncpa [#allocation3 + $0x1], 0 }
   0x5   :  { %15 = vsyncpa [#allocation6], 0 }
   0x6   :  { %16 = vsyncpa [#allocation9], 0 }
   0x7   :  { %17 = vsyncpa [#allocation4], 0 }
   0x8   :  { %19 = vsyncpa [#allocation4 + $0x1], 0  ;;  %s1225_s24 = smov 0   ;;  %s1227_s25 = smov 0  }
   0x9   :  { %s1229_s26 = smov 0   ;;  %s1231_s27 = smov 0  }
   0xa LB: > { %s1246_s28 = sadd.s32 4294967295, %s1174_s27   ;;  %s738_s29 = sadd.s32 4294967294, %s1174_s27   ;;  %s1174_s27 = sphi %s1231_s27, %s1513_s27   ;;  %s1170_s26 = sphi %s1229_s26, %s1512_s26   ;;  %s1166_s25 = sphi %s1227_s25, %s1511_s25   ;;  %s1162_s24 = sphi %s1225_s24, %s1510_s24  }
   0xb   : > { %p45_p0 = scmp.ne.s32.totalorder %s1166_s25, %s1162_s24  ;;  %p1486_p1 = scmp.eq.s32.totalorder %s1246_s28, 0 }
   0xc   : > { %p201_p3 = scmp.eq.s32.totalorder %s738_s29, 1  ;;  %p739_p5 = scmp.ge.s32.totalorder %s1174_s27, 1 }
   0xd   : > { %p1255_p4 = por %p1486_p1, %p45_p0  ;;  %p208_p7 = scmp.lt.s32.totalorder %s1174_s27, 3 }
   0xe   : > { %p1260_p6 = por %p201_p3, %p45_p0  ;;  %s1176_s10 = smov [#allocation5]  }
   0xf   : > { %s1492_s30 = scalar_select %p1255_p4, 1, 0 }
  0x10   : > { %s1493_s8 = scalar_select %p1260_p6, 1, 0 }
  0x11   : > { %p1265_p8 = pnand %p739_p5, %p208_p7  ;;  %s220_s11 = sshll.u32 %s1176_s10, 4  ;;  %s221_s11 = int_to_ptr.vmem [resolvable:$true] %s220_s11 }
  0x12   : > { %s1177_s13 = smov [#allocation7]   ;;  %s1178_s15 = smov [#allocation8]  }
  0x13   : > { %s1494_s9 = scalar_select %p1265_p8, 1, 0 }
  0x14   : > { %p931_p9 = pneg %p1265_p8  ;;  %s233_s14 = sshll.u32 %s1177_s13, 4  ;;  %s234_s14 = int_to_ptr.vmem [resolvable:$true] %s233_s14 }
  0x15   : > { %s246_s16 = sshll.u32 %s1178_s15, 4  ;;  %s1007_s17 = scalar_lea.vmem %s221_s11, 2048  ;;  %s247_s16 = int_to_ptr.vmem [resolvable:$true] %s246_s16 }
  0x16   : > { %p1274_p11 = pnand %p931_p9, %p1486_p1  ;;  %p1008_p13 = scmp.ne.s32.totalorder %s221_s11, %s1007_s17 }
  0x17   : > { %p1015_p5 = scmp.lt.s32.totalorder %s221_s11, %s221_s11  ;;  %p1016_p7 = scmp.lt.s32.totalorder %s1007_s17, %s1007_s17 }
  0x18   : > { %p998_p12 = pneg %p1274_p11 }
  0x19   : > { %p1017_p9 = por %p1016_p7, %p1015_p5 }
  0x1a   : > { %p1010_p0 = pnand %p1008_p13, %p998_p12 }
  0x1c   : > { %p1011_p3 = pneg %p1010_p0 }
  0x1e   : > { %p1018_p10 = pnand %p1017_p9, %p1011_p3 }
  0x20   : > { %1021 = shalt.err (!%p1018_p10)
}
  0x21   : > { %s1179_s18 = smov 128   ;;  %s1180_s19 = smov 8  }
  0x22   : > { %s1496_s1 = sld [smem:[#allocation15_spill]]  ;;  %s1033_s22 = scalar_lea.vmem %s234_s14, 2048 }
  0x23   : > { %p1034_p1 = scmp.ne.s32.totalorder %s234_s14, %s1033_s22  ;;  %p1041_p2 = scmp.lt.s32.totalorder %s234_s14, %s234_s14 }
  0x24   : > { %p1042_p6 = scmp.lt.s32.totalorder %s1033_s22, %s1033_s22 }
  0x25   : > { %p1036_p13 = pnand %p1034_p1, %p998_p12 }
  0x26   : > { %p1043_p5 = por %p1042_p6, %p1041_p2 }
  0x27   : > { %p1037_p0 = pneg %p1036_p13 }
  0x28   : > { %934 = dma.hbm_to_vmem [thread:$0]  (!%p1274_p11), %s1496_s1, 2048, %s221_s11, [#allocation6], %s1179_s18, %s1179_s18, %s1180_s19  }
  0x29   : > { %p1044_p3 = pnand %p1043_p5, %p1037_p0 }
  0x2b   : > { %1047 = shalt.err (!%p1044_p3)
}
  0x2c   : > { %s1497_s2 = sld [smem:[#allocation16_spill]]  ;;  %s1059_s10 = scalar_lea.vmem %s247_s16, 2048 }
  0x2d   : > { %p1060_p10 = scmp.ne.s32.totalorder %s247_s16, %s1059_s10  ;;  %p1067_p9 = scmp.lt.s32.totalorder %s247_s16, %s247_s16 }
  0x2e   : > { %p1068_p13 = scmp.lt.s32.totalorder %s1059_s10, %s1059_s10 }
  0x2f   : > { %p1062_p7 = pnand %p1060_p10, %p998_p12 }
  0x30   : > { %p1069_p4 = por %p1068_p13, %p1067_p9 }
  0x31   : > { %p1063_p1 = pneg %p1062_p7 }
  0x32   : > { %937 = dma.hbm_to_vmem [thread:$0]  (!%p1274_p11), %s1497_s2, 2048, %s234_s14, [#allocation6], %s1179_s18, %s1179_s18, %s1180_s19  }
  0x33   : > { %p1070_p2 = pnand %p1069_p4, %p1063_p1 }
  0x35   : > { %1073 = shalt.err (!%p1070_p2)
}
  0x36   : > { %940 = dma.hbm_to_vmem [thread:$0]  (!%p1274_p11), %s1481_s3, 2048, %s247_s16, [#allocation9], %s1179_s18, %s1179_s18, %s1180_s19  }
  0x37   : > { %s1305_s14 = sadd.s32 1, %s1174_s27   ;;  %s32_s12 = sadd.s32 1, %s1170_s26 }
  0x38   : > { %s29_s15 = ssub.s32 %s1174_s27, %s1305_s14  ;;  %p39_p6 = scmp.ne.s32.totalorder %s1170_s26, %s1166_s25 }
  0x39   : > { %p30_p4 = scmp.eq.s32.totalorder %s29_s15, 0  ;;  %p40_p12 = scmp.eq.s32.totalorder %s1174_s27, 0 }
  0x3a   : > { %p952_p0 = scmp.lt.s32.totalorder %s1174_s27, 2  ;;  %p1498_p3 = scmp.eq.s32.totalorder %s1246_s28, 1 }
  0x3b   : > { %s1315_s17 = scalar_select %p30_p4, %s1170_s26, %s32_s12  }
  0x3c   : > { %p41_p5 = por %p40_p12, %p39_p6  ;;  %p1319_p10 = por %p1498_p3, %p39_p6 }
  0x3d   : > { %s269_s21 = sand.u32 1, %s1170_s26   ;;  %s745_s22 = sshll.u32 %s1174_s27, 7 }
  0x3e   : > { %s1499_s20 = scalar_select %p1319_p10, 1, 0 }
  0x3f   : > { %s744_s16 = sshll.u32 %s269_s21, 3  ;;  %s1328_s23 = scalar_lea.hbm %s1478_s0, %s745_s22 }
  0x40   : > { %s273_s29 = scalar_lea.vmem [#allocation2], %s744_s16  ;;  %p1330_p11 = pnand %p952_p0, %p41_p5 }
  0x41   : > { %s280_s10 = sshll.u32 %s273_s29, 4  ;;  %s270_s13 = scalar_lea.sflag [#allocation3], %s269_s21  ;;  %s281_s10 = int_to_ptr.vmem [resolvable:$true] %s280_s10 }
  0x42   : > { %s1074_s15 = scalar_lea.hbm %s1328_s23, 128  ;;  %p1076_p1 = pneg %p1330_p11 }
  0x43   : > { %p1075_p7 = scmp.ne.s32.totalorder %s1328_s23, %s1074_s15  ;;  %s1079_s18 = scalar_lea.hbm %s1478_s0, 256 }
  0x44   : > { %p1080_p2 = scmp.lt.s32.totalorder %s1328_s23, %s1478_s0  ;;  %p1081_p4 = scmp.lt.s32.totalorder %s1079_s18, %s1074_s15 }
  0x45   : > { %p1077_p9 = pnand %p1076_p1, %p1075_p7 }
  0x46   : > { %p1082_p6 = por %p1081_p4, %p1080_p2 }
  0x47   : > { %p1078_p13 = pneg %p1077_p9 }
  0x49   : > { %p1083_p12 = pnand %p1082_p6, %p1078_p13 }
  0x4b   : > { %1086 = shalt.err (!%p1083_p12)
}
  0x4c   : > { %s1087_s29 = scalar_lea.vmem %s281_s10, 128  ;;  %s1181_s21 = smov [#allocation2]  }
  0x4d   : > { %p1088_p0 = scmp.ne.s32.totalorder %s281_s10, %s1087_s29  ;;  %s1092_s1 = sshll.u32 %s1181_s21, 4  ;;  %s1093_s1 = int_to_ptr.vmem [resolvable:$false] %s1092_s1 }
  0x4e   : > { %s1094_s2 = scalar_lea.vmem %s1093_s1, 256  ;;  %p1095_p7 = scmp.lt.s32.totalorder %s281_s10, %s1093_s1 }
  0x4f   : > { %p1090_p5 = pnand %p1088_p0, %p1076_p1  ;;  %p1096_p9 = scmp.lt.s32.totalorder %s1094_s2, %s1087_s29 }
  0x51   : > { %p1091_p3 = pneg %p1090_p5  ;;  %p1097_p10 = por %p1096_p9, %p1095_p7 }
  0x53   : > { %p1098_p8 = pnand %p1097_p10, %p1091_p3 }
  0x55   : > { %1101 = shalt.err (!%p1098_p8)
}
  0x56   : > { %944 = dma.hbm_to_vmem [thread:$0]  (!%p1330_p11), %s1328_s23, 128, %s281_s10, %s270_s13  }
  0x57   : > { %p1501_p13 = scmp.ne.s32.totalorder %s1494_s9, 0 }
  0x58   : > { %s1351_s15 = sand.u32 (!%p1501_p13), 1, %s1166_s25   ;;  %p1502_p8 = scmp.ne.s32.totalorder (!%p1501_p13), %s1492_s30, 0 }
  0x59   : > { %289 = sbr.rel (%p1501_p13) target bundleno = 739 (0x2e3), region = 48  ;;  %s747_s12 = sshll.u32 (!%p1501_p13), %s1351_s15, 3 }
  0x5a   : > { %s292_s1 = scalar_lea.sflag (!%p1501_p13), [#allocation3], %s1351_s15  ;;  %s1357_s2 = scalar_lea.vmem (!%p1501_p13), [#allocation2], %s747_s12 }
  0x5e   : > { %1145 = dma.done.wait (%p1502_p8), %s292_s1, 128  }
  0x5f   : > { %1147 = vsyncadd (%p1502_p8), %s292_s1, 4294967168  ;;  %p1503_p10 = scmp.eq.s32.totalorder %s1246_s28, 0 }
  0x61   : > { %1149 = dma.done.wait (%p1503_p10), [#allocation6], 4096   ;;  %p1504_p11 = pmov %p1503_p10 }
  0x62   : > { %p1505_p1 = pmov %p1503_p10 }
  0x63   : > { %1151 = vsyncadd (%p1504_p11), [#allocation6], 4294963200 }
  0x64   : > { %1153 = dma.done.wait (%p1505_p1), [#allocation9], 2048   ;;  %p1506_p2 = pmov %p1505_p1 }
  0x65   : > { %v1182_v0 = vmov 0.0   ;;  %vm1183_vm0 = vmmov 0   ;;  %v354_v1 = vld [vmem:[#allocation5 + $0x78] sm:$0xff]  ;;  %v353_v2 = vld [vmem:[#allocation5 + $0x70] sm:$0xff]  ;;  %v352_v3 = vld [vmem:[#allocation5 + $0x68] sm:$0xff]  ;;  %s756_s22 = sshll.u32 %s1246_s28, 7 }
  0x66   : > { %1155 = vsyncadd (%p1506_p2), [#allocation9], 4294965248  ;;  %810 = vmatprep.subr.mxu0 %v1182_v0  ;;  %842 = vmatprep.mubr.msk.f32.mxu0 %vm1183_vm0, %v1182_v0  ;;  %v351_v4 = vld [vmem:[#allocation5 + $0x60] sm:$0xff]  ;;  %v450_v5 = vld [vmem:[#allocation7 + $0x78] sm:$0xff]  ;;  %s337_s18 = scalar_lea.vmem [#allocation10], %s747_s12  ;;  %s1441_s21 = scalar_lea.hbm %s1485_s7, %s756_s22 }
  0x67   : > { %845 = vmatprep.subr.mxu1 %v1182_v0  ;;  %877 = vmatprep.mubr.msk.f32.mxu1 %vm1183_vm0, %v1182_v0  ;;  %v350_v6 = vld [vmem:[#allocation5 + $0x58] sm:$0xff]  ;;  %v449_v7 = vld [vmem:[#allocation7 + $0x70] sm:$0xff]  ;;  %v448_v8 = vld [vmem:[#allocation7 + $0x68] sm:$0xff]  ;;  %s639_s19 = sshll.u32 %s337_s18, 4  ;;  %s626_s1 = scalar_lea.sflag [#allocation4], %s1351_s15  ;;  %s640_s19 = int_to_ptr.vmem [resolvable:$true] %s639_s19 }
  0x68   : > { %811 = vmatpush3.msra.mxu0 %v354_v1  ;;  %846 = vmatpush3.msra.mxu1 %v450_v5  ;;  %v349_v9 = vld [vmem:[#allocation5 + $0x50] sm:$0xff]  ;;  %v447_v10 = vld [vmem:[#allocation7 + $0x60] sm:$0xff]  ;;  %v348_v11 = vld [vmem:[#allocation5 + $0x48] sm:$0xff]  ;;  %p1507_p6 = scmp.ne.s32.totalorder %s1499_s20, 0  ;;  %s1184_s28 = smov [#allocation10]  }
  0x69   : > { %812 = vmatprep.subr.mxu0 %v1182_v0  ;;  %847 = vmatprep.subr.mxu1 %v1182_v0  ;;  %v446_v12 = vld [vmem:[#allocation7 + $0x58] sm:$0xff]  ;;  %v347_v13 = vld [vmem:[#allocation5 + $0x40] sm:$0xff]  ;;  %v445_v14 = vld [vmem:[#allocation7 + $0x50] sm:$0xff]  ;;  %s1106_s30 = sshll.u32 %s1184_s28, 4  ;;  %s1107_s30 = int_to_ptr.vmem [resolvable:$false] %s1106_s30 }
  0x6a   : > { %813 = vmatpush3.msra.mxu0 %v353_v2  ;;  %848 = vmatpush3.msra.mxu1 %v449_v7  ;;  %v346_v15 = vld [vmem:[#allocation5 + $0x38] sm:$0xff]  ;;  %v444_v16 = vld [vmem:[#allocation7 + $0x48] sm:$0xff]  ;;  %v345_v17 = vld [vmem:[#allocation5 + $0x30] sm:$0xff]  ;;  %s1108_s12 = scalar_lea.vmem %s1107_s30, 256  ;;  %p1109_p5 = scmp.lt.s32.totalorder %s640_s19, %s1107_s30 }
  0x6b   : > { %814 = vmatprep.subr.mxu0 %v1182_v0  ;;  %849 = vmatprep.subr.mxu1 %v1182_v0  ;;  %v443_v18 = vld [vmem:[#allocation7 + $0x40] sm:$0xff]  ;;  %v344_v19 = vld [vmem:[#allocation5 + $0x28] sm:$0xff]  ;;  %v442_v20 = vld [vmem:[#allocation7 + $0x38] sm:$0xff] }
  0x6c   : > { %815 = vmatpush3.msra.mxu0 %v352_v3  ;;  %850 = vmatpush3.msra.mxu1 %v448_v8  ;;  %v343_v21 = vld [vmem:[#allocation5 + $0x20] sm:$0xff]  ;;  %v441_v22 = vld [vmem:[#allocation7 + $0x30] sm:$0xff]  ;;  %v342_v23 = vld [vmem:[#allocation5 + $0x18] sm:$0xff] }
  0x6d   : > { %816 = vmatprep.subr.mxu0 %v1182_v0  ;;  %851 = vmatprep.subr.mxu1 %v1182_v0  ;;  %v440_v24 = vld [vmem:[#allocation7 + $0x28] sm:$0xff]  ;;  %v341_v25 = vld [vmem:[#allocation5 + $0x10] sm:$0xff]  ;;  %v439_v26 = vld [vmem:[#allocation7 + $0x20] sm:$0xff] }
  0x6e   : > { %817 = vmatpush3.msra.mxu0 %v351_v4  ;;  %852 = vmatpush3.msra.mxu1 %v447_v10  ;;  %v340_v27 = vld [vmem:[#allocation5 + $0x8] sm:$0xff]  ;;  %v438_v28 = vld [vmem:[#allocation7 + $0x18] sm:$0xff]  ;;  %v339_v29 = vld [vmem:[#allocation5] sm:$0xff] }
  0x6f   : > { %818 = vmatprep.subr.mxu0 %v1182_v0  ;;  %853 = vmatprep.subr.mxu1 %v1182_v0  ;;  %v338_v30 = vld [vmem:[%s1357_s2] sm:$0xff]  ;;  %v436_v32 = vld [vmem:[#allocation7 + $0x8] sm:$0xff]  ;;  %v435_v33 = vld [vmem:[#allocation7] sm:$0xff]  ;;  %s1102_s2 = scalar_lea.vmem %s640_s19, 128 }
  0x70   : > { %819 = vmatpush3.msra.mxu0 %v350_v6  ;;  %854 = vmatpush3.msra.mxu1 %v446_v12  ;;  %v437_v31 = vld [vmem:[#allocation7 + $0x10] sm:$0xff]  ;;  %v546_v34 = vld [vmem:[#allocation8 + $0x78] sm:$0xff]  ;;  %v544_v36 = vld [vmem:[#allocation8 + $0x68] sm:$0xff]  ;;  %p1103_p4 = scmp.ne.s32.totalorder %s640_s19, %s1102_s2  ;;  %p1110_p3 = scmp.lt.s32.totalorder %s1108_s12, %s1102_s2 }
  0x71   : > { %820 = vmatprep.subr.mxu0 %v1182_v0  ;;  %855 = vmatprep.subr.mxu1 %v1182_v0  ;;  %v545_v35 = vld [vmem:[#allocation8 + $0x70] sm:$0xff]  ;;  %v543_v37 = vld [vmem:[#allocation8 + $0x60] sm:$0xff]  ;;  %v542_v38 = vld [vmem:[#allocation8 + $0x58] sm:$0xff] }
  0x72   : > { %821 = vmatpush3.msra.mxu0 %v349_v9  ;;  %856 = vmatpush3.msra.mxu1 %v445_v14  ;;  %v541_v39 = vld [vmem:[#allocation8 + $0x50] sm:$0xff]  ;;  %v540_v40 = vld [vmem:[#allocation8 + $0x48] sm:$0xff]  ;;  %v539_v41 = vld [vmem:[#allocation8 + $0x40] sm:$0xff]  ;;  %p1104_p12 = pnand %p1103_p4, %p1507_p6  ;;  %p1111_p7 = por %p1110_p3, %p1109_p5 }
  0x73   : > { %822 = vmatprep.subr.mxu0 %v1182_v0  ;;  %857 = vmatprep.subr.mxu1 %v1182_v0  ;;  %v538_v42 = vld [vmem:[#allocation8 + $0x38] sm:$0xff]  ;;  %v537_v43 = vld [vmem:[#allocation8 + $0x30] sm:$0xff]  ;;  %v536_v44 = vld [vmem:[#allocation8 + $0x28] sm:$0xff] }
  0x74   : > { %823 = vmatpush3.msra.mxu0 %v348_v11  ;;  %858 = vmatpush3.msra.mxu1 %v444_v16  ;;  %v535_v45 = vld [vmem:[#allocation8 + $0x20] sm:$0xff]  ;;  %v534_v46 = vld [vmem:[#allocation8 + $0x18] sm:$0xff]  ;;  %v752_v47 = vld [vmem:[%s1482_s4] ss:$0 sm:$0xff]  ;;  %p1105_p0 = pneg %p1104_p12 }
  0x75   : > { %824 = vmatprep.subr.mxu0 %v1182_v0  ;;  %859 = vmatprep.subr.mxu1 %v1182_v0  ;;  %v533_v53 = vld [vmem:[#allocation8 + $0x10] sm:$0xff]  ;;  %v532_v54 = vld [vmem:[#allocation8 + $0x8] sm:$0xff]  ;;  %v531_v55 = vld [vmem:[#allocation8] sm:$0xff] }
  0x76   : > { %825 = vmatpush3.msra.mxu0 %v347_v13  ;;  %860 = vmatpush3.msra.mxu1 %v443_v18  ;;  %v753_v56 = vld [vmem:[%s1483_s5] ss:$0 sm:$0xff]  ;;  %p1112_p9 = pnand %p1111_p7, %p1105_p0 }
  0x77   : > { %826 = vmatprep.subr.mxu0 %v1182_v0  ;;  %861 = vmatprep.subr.mxu1 %v1182_v0  ;;  %v754_v62 = vld [vmem:[%s1484_s6] ss:$0 sm:$0xff] }
  0x78   : > { %827 = vmatpush3.msra.mxu0 %v346_v15  ;;  %862 = vmatpush3.msra.mxu1 %v442_v20 }
  0x79   : > { %828 = vmatprep.subr.mxu0 %v1182_v0  ;;  %863 = vmatprep.subr.mxu1 %v1182_v0 }
  0x7a   : > { %829 = vmatpush3.msra.mxu0 %v345_v17  ;;  %864 = vmatpush3.msra.mxu1 %v441_v22 }
  0x7b   : > { %830 = vmatprep.subr.mxu0 %v1182_v0  ;;  %865 = vmatprep.subr.mxu1 %v1182_v0 }
  0x7c   : > { %831 = vmatpush3.msra.mxu0 %v344_v19  ;;  %866 = vmatpush3.msra.mxu1 %v440_v24 }
  0x7d   : > { %832 = vmatprep.subr.mxu0 %v1182_v0  ;;  %867 = vmatprep.subr.mxu1 %v1182_v0 }
  0x7e   : > { %833 = vmatpush3.msra.mxu0 %v343_v21  ;;  %868 = vmatpush3.msra.mxu1 %v439_v26 }
  0x7f   : > { %834 = vmatprep.subr.mxu0 %v1182_v0  ;;  %869 = vmatprep.subr.mxu1 %v1182_v0 }
  0x80   : > { %835 = vmatpush3.msra.mxu0 %v342_v23  ;;  %870 = vmatpush3.msra.mxu1 %v438_v28 }
  0x81   : > { %836 = vmatprep.subr.mxu0 %v1182_v0  ;;  %871 = vmatprep.subr.mxu1 %v1182_v0 }
  0x82   : > { %837 = vmatpush3.msra.mxu0 %v341_v25  ;;  %872 = vmatpush3.msra.mxu1 %v437_v31 }
  0x83   : > { %838 = vmatprep.subr.mxu0 %v1182_v0  ;;  %873 = vmatprep.subr.mxu1 %v1182_v0 }
  0x84   : > { %839 = vmatpush3.msra.mxu0 %v340_v27  ;;  %874 = vmatpush3.msra.mxu1 %v436_v32 }
  0x85   : > { %840 = vmatprep.subr.mxu0 %v1182_v0  ;;  %875 = vmatprep.subr.mxu1 %v1182_v0 }
  0x86   : > { %841 = vmatpush3.msra.mxu0 %v339_v29  ;;  %876 = vmatpush3.msra.mxu1 %v435_v33 }
  0x87   : > { %843 = vmatmul.mubr.f32.vlgmr.msra.gmra.mxu0 %v338_v30  ;;  %880 = vmatprep.subr.mxu0 %v1182_v0 }
  0x88   : > { %912 = vmatprep.mubr.msk.f32.mxu0 %vm1183_vm0, %v1182_v0  ;;  %881 = vmatpush3.msra.mxu0 %v546_v34 }
  0x89   : > { %882 = vmatprep.subr.mxu0 %v1182_v0 }
  0x8a   : > { %883 = vmatpush3.msra.mxu0 %v545_v35 }
  0x8b   : > { %884 = vmatprep.subr.mxu0 %v1182_v0 }
  0x8c   : > { %885 = vmatpush3.msra.mxu0 %v544_v36 }
  0x8d   : > { %886 = vmatprep.subr.mxu0 %v1182_v0 }
  0x8e   : > { %887 = vmatpush3.msra.mxu0 %v543_v37 }
  0x8f   : > { %888 = vmatprep.subr.mxu0 %v1182_v0 }
  0x90   : > { %889 = vmatpush3.msra.mxu0 %v542_v38 }
  0x91   : > { %890 = vmatprep.subr.mxu0 %v1182_v0 }
  0x92   : > { %891 = vmatpush3.msra.mxu0 %v541_v39 }
  0x93   : > { %892 = vmatprep.subr.mxu0 %v1182_v0 }
  0x94   : > { %893 = vmatpush3.msra.mxu0 %v540_v40 }
  0x95   : > { %894 = vmatprep.subr.mxu0 %v1182_v0 }
  0x96   : > { %895 = vmatpush3.msra.mxu0 %v539_v41 }
  0x97   : > { %896 = vmatprep.subr.mxu0 %v1182_v0 }
  0x98   : > { %897 = vmatpush3.msra.mxu0 %v538_v42 }
  0x99   : > { %898 = vmatprep.subr.mxu0 %v1182_v0 }
  0x9a   : > { %899 = vmatpush3.msra.mxu0 %v537_v43 }
  0x9b   : > { %900 = vmatprep.subr.mxu0 %v1182_v0 }
  0x9c   : > { %901 = vmatpush3.msra.mxu0 %v536_v44 }
  0x9d   : > { %902 = vmatprep.subr.mxu0 %v1182_v0 }
  0x9e   : > { %903 = vmatpush3.msra.mxu0 %v535_v45 }
  0x9f   : > { %904 = vmatprep.subr.mxu0 %v1182_v0 }
  0xa0   : > { %905 = vmatpush3.msra.mxu0 %v534_v46 }
  0xa1   : > { %906 = vmatprep.subr.mxu0 %v1182_v0 }
  0xa2   : > { %907 = vmatpush3.msra.mxu0 %v533_v53 }
  0xa3   : > { %908 = vmatprep.subr.mxu0 %v1182_v0 }
  0xa4   : > { %909 = vmatpush3.msra.mxu0 %v532_v54 }
  0xa5   : > { %910 = vmatprep.subr.mxu0 %v1182_v0 }
  0xa6   : > { %911 = vmatpush3.msra.mxu0 %v531_v55 }
 0x147   : > { %v428_v48 = vpop.f32.mrf.mxu0 }
 0x148   : > { %v429_v49 = vadd.f32 %v752_v47, %v428_v48 }
 0x149   : > { %v844_v50 = vpop.f32.mrf.mxu0 }
 0x14a   : > { %v433_v51 = vmul.f32 0.2, %v429_v49  ;;  %vm432_vm1 = vcmp.ge.f32.partialorder %v429_v49, 0.0 }
 0x14c   : > { %v434_v52 = vsel %vm432_vm1, %v429_v49, %v433_v51 }
 0x14d   : > { %878 = vmatmul.mubr.f32.vlgmr.msra.gmra.mxu1 %v434_v52 }
 0x20d   : > { %v524_v57 = vpop.f32.mrf.mxu1 }
 0x20e   : > { %v525_v58 = vadd.f32 %v753_v56, %v524_v57 }
 0x20f   : > { %v879_v59 = vpop.f32.mrf.mxu1 }
 0x210   : > { %vm528_vm2 = vcmp.ge.f32.partialorder %v525_v58, 0.0  ;;  %v529_v60 = vmul.f32 0.2, %v525_v58 }
 0x212   : > { %v530_v61 = vsel %vm528_vm2, %v525_v58, %v529_v60 }
 0x213   : > { %913 = vmatmul.mubr.f32.vlgmr.msra.gmra.mxu0 %v530_v61 }
 0x2d3   : > { %v620_v63 = vpop.f32.mrf.mxu0 }
 0x2d4   : > { %v621_v0 = vadd.f32 %v754_v62, %v620_v63 }
 0x2d5   : > { %v914_v1 = vpop.f32.mrf.mxu0 }
 0x2d6   : > { %624 = vst [vmem:[%s337_s18] sm:$0xff] %v621_v0 }
 0x2d7   : > { %1115 = shalt.err (!%p1112_p9)
}
 0x2d8   : > { %s1116_s9 = scalar_lea.hbm %s1441_s21, 128  ;;  %s1120_s10 = scalar_lea.hbm %s1485_s7, 256 }
 0x2d9   : > { %p1117_p13 = scmp.ne.s32.totalorder %s1441_s21, %s1116_s9  ;;  %p1121_p11 = scmp.lt.s32.totalorder %s1441_s21, %s1485_s7 }
 0x2da   : > { %p1122_p1 = scmp.lt.s32.totalorder %s1120_s10, %s1116_s9 }
 0x2db   : > { %p1118_p8 = pnand %p1117_p13, %p1507_p6 }
 0x2dc   : > { %p1123_p2 = por %p1122_p1, %p1121_p11 }
 0x2dd   : > { %p1119_p10 = pneg %p1118_p8 }
 0x2df   : > { %p1124_p4 = pnand %p1123_p2, %p1119_p10 }
 0x2e1   : > { %1127 = shalt.err (!%p1124_p4)
}
 0x2e2   : > { %929 = dma.vmem_to_hbm [thread:$0]  (%p1507_p6), %s640_s19, 128, %s1441_s21, %s626_s1  }
 0x2e3 PF: > { %s651_s22 = sand.u32 1, %s1162_s24   ;;  %p1508_p12 = scmp.ne.s32.totalorder %s1493_s8, 0 }
 0x2e4   : > { %p1509_p0 = scmp.ge.s32.totalorder %s1174_s27, 2  ;;  %s652_s18 = scalar_lea.sflag [#allocation4], %s651_s22 }
 0x2e6   : > { %p946_p5 = pnand %p1509_p0, %p1508_p12 }
 0x2e8   : > { %p947_p3 = pneg %p946_p5 }
 0x2ea   : > { %1157 = dma.done.wait (%p947_p3), %s652_s18, 128  }
 0x2eb   : > { %1159 = vsyncadd (%p947_p3), %s652_s18, 4294967168  ;;  %p22_p7 = scmp.ge.s32.totalorder %s1305_s14, 4   ;;  %s1510_s24 = smov %s1166_s25 }
 0x2ec   : > { %s1511_s25 = smov %s1170_s26  ;;  %s1512_s26 = smov %s1315_s17 }
 0x2ed   : > { %s1513_s27 = smov %s1305_s14  ;;  %24 = sbr.rel (!%p22_p7) target bundleno = 10 (0xa), region = 105 }
 0x2f2   :  { %657 = vsyncpa [#allocation3], 1 }
 0x2f3   :  { %659 = vsyncpa [#allocation3 + $0x1], 1 }
 0x2f4   :  { %660 = vsyncpa [#allocation6], 1 }
 0x2f5   :  { %661 = vsyncpa [#allocation9], 1 }
 0x2f6   :  { %662 = vsyncpa [#allocation4], 1 }
 0x2f7   :  { %664 = vsyncpa [#allocation4 + $0x1], 1 }

</bundles_post_ra>
